<compile_context>
chip_gen: v6e
topology: v6e:2x2x1
jax: 0.10.0
libtpu: 0.0.40
codegen_flags: <defaults>
</compile_context>

<pallas_src>
import functools

import jax
import jax.numpy as jnp
from jax import lax
from jax.experimental import pallas as pl
from jax.experimental.pallas import tpu as pltpu


def _gem_kernel(x_ref, o_ref, *, p_int, p_float, eps, hw):
    # x_ref: (block_n, C, HW) VMEM tile (free NCHW view) ; o_ref: (block_n, 1, C)
    x = x_ref[...].astype(jnp.float32)                 # f32 before pow (bf16-safe)
    x = jnp.maximum(x, jnp.float32(eps))               # clamp(min=eps)
    if p_int is not None:
        xp = lax.integer_pow(x, p_int)                 # x**p as VPU multiplies
    else:
        xp = x ** jnp.float32(p_float)                 # fallback for non-integer p
    # Cross-lane (XLU) reduction over the spatial axis; XLU is idle in this
    # HBM-bandwidth-bound kernel, so the reduce is effectively free.
    m = jnp.sum(xp, axis=-1) * jnp.float32(1.0 / hw)   # (block_n, C), f32
    if p_int != 1:
        m = m ** jnp.float32(1.0 / p_float)            # root only on reduced result
    o_ref[...] = m[:, None, :].astype(o_ref.dtype)


def _tpu_vmem_and_cores():
    """(physical VMEM bytes, TensorCores per chip) with conservative fallbacks."""
    try:
        vmem_cap = int(pltpu.get_tpu_info().vmem_capacity_bytes)
    except Exception:
        vmem_cap = 64 * 1024 * 1024                    # conservative (v7x-sized)
    try:
        kind = jax.devices()[0].device_kind.lower()
    except Exception:
        kind = ""
    num_tc = 2 if "v7" in kind else 1                  # v7x has 2 TCs/chip
    return vmem_cap, num_tc


def gem(x, p=1, eps=1e-6, block_n=None):
    """GeM pooling. x: (N, C, H, W) -> (N, C, 1, 1). (p=1 == AdaptiveAvgPool2d((1,1)))."""
    N, C, H, W = x.shape
    HW = H * W
    itemsize = x.dtype.itemsize

    # Free view (no transpose, no extra HBM pass): NCHW -> (N, C, HW).
    x3 = x.reshape(N, C, HW)

    vmem_cap, num_tc = _tpu_vmem_and_cores()

    # Per-batch-row VMEM footprint: double-buffered input tile + f32 temps
    # created by the cast/clamp/pow before the reduce.
    row_in_bytes = C * HW * itemsize
    row_f32_bytes = C * HW * 4
    per_row_bytes = 2 * row_in_bytes + 2 * row_f32_bytes

    if block_n is None:
        budget = vmem_cap // 4                         # generation-aware budget
        block_n = max(1, min(N, budget // max(per_row_bytes, 1)))
        # Only split the grid for multi-TensorCore chips (v7x); on single-TC
        # v5e/v6e a forced split is pure per-step overhead.
        if num_tc > 1 and N >= num_tc:
            block_n = min(block_n, pl.cdiv(N, num_tc))
        block_n = int(block_n)
    grid = (pl.cdiv(N, block_n),)

    # Explicit scoped-VMEM limit with headroom (v5e's 16 MiB default is too small
    # for large tiles); never exceed physical capacity.
    needed = block_n * per_row_bytes + 4 * block_n * C * 4
    vmem_limit = int(min(vmem_cap - (16 << 20),
                         max(vmem_cap // 2, needed + (8 << 20))))

    p_float = float(p)
    p_int = int(p_float) if p_float == int(p_float) else None

    kernel = functools.partial(
        _gem_kernel, p_int=p_int, p_float=p_float, eps=eps, hw=HW)

    n_pow_mul = max(abs(p_int) - 1, 0) if p_int is not None else 1
    cost = pl.CostEstimate(
        flops=(2 + n_pow_mul) * N * C * HW + 2 * N * C,   # clamp + pow muls + add
        transcendentals=0 if p_int == 1 else 2 * N * C,   # exp/log for 1/p root
        bytes_accessed=N * C * HW * itemsize + N * C * itemsize,
    )

    out = pl.pallas_call(
        kernel,
        out_shape=jax.ShapeDtypeStruct((N, 1, C), x.dtype),
        grid_spec=pl.GridSpec(
            grid=grid,
            in_specs=[pl.BlockSpec((block_n, C, HW), lambda i: (i, 0, 0))],
            out_specs=pl.BlockSpec((block_n, 1, C), lambda i: (i, 0, 0)),
        ),
        compiler_params=pltpu.CompilerParams(
            dimension_semantics=("parallel",),
            vmem_limit_bytes=vmem_limit),
        cost_estimate=cost,
    )(x3)
    return out.reshape(N, C, 1, 1)


def gem_ref(x, p=1, eps=1e-6):
    # Pure-JAX reference (mirrors the PyTorch module; p=1 == AdaptiveAvgPool2d).
    xc = jnp.maximum(x.astype(jnp.float32), jnp.float32(eps))
    m = jnp.mean(xc ** p, axis=(2, 3), keepdims=True)
    return (m ** (1.0 / p)).astype(x.dtype)


if __name__ == "__main__":
    # No learnable parameters (p, eps are plain Python scalars).
    key = jax.random.PRNGKey(0)
    N, C, H, W = 2, 4, 16, 16
    x = jax.random.normal(key, (N, C, H, W), dtype=jnp.float32)

    # p=1: exactly the ResNet's AdaptiveAvgPool2d((1,1)).
    out1 = jax.block_until_ready(gem(x, p=1, eps=1e-6))
    ref1 = gem_ref(x, p=1, eps=1e-6)
    assert out1.shape == (N, C, 1, 1), out1.shape
    assert jnp.allclose(out1, ref1, atol=1e-5, rtol=1e-5), (
        float(jnp.max(jnp.abs(out1 - ref1))))

    # p=3: general GeM path (exercises integer_pow + 1/p root).
    out3 = jax.block_until_ready(gem(x, p=3, eps=1e-6))
    ref3 = gem_ref(x, p=3, eps=1e-6)
    assert out3.shape == (N, C, 1, 1), out3.shape
    assert jnp.allclose(out3, ref3, atol=1e-5, rtol=1e-5), (
        float(jnp.max(jnp.abs(out3 - ref3))))

    print("KERNEL_OK")
</pallas_src>

<mosaic_0001>
module attributes {stable_mosaic.version = 11 : i64} {
  func.func @_gem_kernel(%arg0: i32, %arg1: memref<2x4x256xf32, #tpu.memory_space<vmem>>, %arg2: memref<2x1x4xf32, #tpu.memory_space<vmem>>) attributes {dimension_semantics = [#tpu.dimension_semantics<parallel>], iteration_bounds = array<i64: 1>, scalar_prefetch = 0 : i64, scratch_operands = 0 : i64, tpu.core_type = #tpu.core_type<tc>, window_params = [{transform_indices = @transform_0, window_bounds = array<i64: 2, 4, 256>}, {transform_indices = @transform_1, window_bounds = array<i64: 2, 1, 4>}]} {
    %c0 = arith.constant 0 : index
    %c0_0 = arith.constant 0 : index
    %c0_1 = arith.constant 0 : index
    %0 = vector.load %arg1[%c0, %c0_0, %c0_1] : memref<2x4x256xf32, #tpu.memory_space<vmem>>, vector<2x4x256xf32>
    %cst = arith.constant 9.99999997E-7 : f32
    %1 = vector.broadcast %cst : f32 to vector<2x4x256xf32>
    %2 = arith.maximumf %0, %1 : vector<2x4x256xf32>
    %cst_2 = arith.constant dense<0.000000e+00> : vector<2x4xf32>
    %3 = vector.multi_reduction <add>, %2, %cst_2 [2] : vector<2x4x256xf32> to vector<2x4xf32>
    %cst_3 = arith.constant 3.906250e-03 : f32
    %4 = vector.broadcast %cst_3 : f32 to vector<2x4xf32>
    %5 = arith.mulf %3, %4 : vector<2x4xf32>
    %6 = vector.shape_cast %5 : vector<2x4xf32> to vector<2x1x4xf32>
    %c0_4 = arith.constant 0 : index
    %c0_5 = arith.constant 0 : index
    %c0_6 = arith.constant 0 : index
    %7 = vector.load %arg2[%c0_4, %c0_5, %c0_6] : memref<2x1x4xf32, #tpu.memory_space<vmem>>, vector<2x1x4xf32>
    tpu.vector_store %arg2[%c0_4, %c0_5, %c0_6], %6 {strides = array<i32>} : memref<2x1x4xf32, #tpu.memory_space<vmem>>, vector<2x1x4xf32>,
    return
  }
  func.func @transform_0(%arg0: i32) -> (i32, i32, i32) {
    %c0_i32 = arith.constant 0 : i32
    %c0_i32_0 = arith.constant 0 : i32
    %c0_i32_1 = arith.constant 0 : i32
    return %arg0, %c0_i32, %c0_i32_0 : i32, i32, i32
  }
  func.func @transform_1(%arg0: i32) -> (i32, i32, i32) {
    %c0_i32 = arith.constant 0 : i32
    %c0_i32_0 = arith.constant 0 : i32
    %c0_i32_1 = arith.constant 0 : i32
    return %arg0, %c0_i32, %c0_i32_0 : i32, i32, i32
  }
}

</mosaic_0001>

<bundles_post_ra>
// kernel: tpu_custom_call.1
= control target key start
LH: loop header
LB: loop body
LE: loop exit
PB: predicated region body
PF: predicated region fallthrough
CT: control target
= control target key end

     0   :  { %6 = vsyncpa [#allocation3], 0  ;;  %s152_s0 = inlined_call_operand.hbm [shape: f32[2,4,256], index: 0, kind: input, shape index: {}]   ;;  %s153_s1 = inlined_call_operand.hbm [shape: f32[2,1,4], index: 1, kind: output, shape index: {}]  }
   0x1   :  { %7 = vsyncpa [#allocation4], 0  ;;  %s130_s6 = smov [#allocation2]  }
   0x2   :  { %s13_s7 = sshll.u32 %s130_s6, 4  ;;  %s14_s7 = int_to_ptr.vmem [resolvable:$true] %s13_s7 }
   0x3   :  { %s94_s8 = scalar_lea.vmem %s14_s7, 256  ;;  %p99_p1 = scmp.lt.s32.totalorder %s14_s7, %s14_s7 }
   0x4   :  { %p95_p0 = scmp.ne.s32.totalorder %s14_s7, %s94_s8  ;;  %p100_p2 = scmp.lt.s32.totalorder %s94_s8, %s94_s8 }
   0x6   :  { %p101_p3 = por %p100_p2, %p99_p1 }
   0x8   :  { %p102_p4 = pnand %p101_p3, %p95_p0 }
   0xa   :  { %105 = shalt.err (!%p102_p4)
}
   0xb   :  { %s131_s9 = smov 128   ;;  %s132_s10 = smov 8  }
   0xc   :  { %19 = dma.hbm_to_vmem [thread:$0]  %s152_s0, 256, %s14_s7, [#allocation3], %s131_s9, %s131_s9, %s132_s10  }
   0xd   :  { %126 = dma.done.wait [#allocation3], 256  }
   0xe   :  { %127 = vsyncadd [#allocation3], 4294967040  ;;  %v23_v0 = vld [vmem:[#allocation2] sm:$0xff]  ;;  %vm33_vm0 = vcmask 1043456   ;;  %v24_v1 = vld [vmem:[#allocation2 + $0x8] sm:$0xff]  ;;  %v48_v12 = vlaneseq  ;;  %vm60_vm1 = vcmask 24576  }
   0xf   :  { %v25_v2 = vmax.f32 %v23_v0, 1e-06  ;;  %v26_v3 = vmax.f32 %v24_v1, 1e-06  ;;  %s133_s0 = smov [#allocation5]  }
  0x10   :  { %v49_v13 = vand.u32 127, %v48_v12  ;;  %v51_v14 = vshrl.u32 %v48_v12, 7  ;;  %s68_s13 = sshll.u32 %s133_s0, 4  ;;  %s69_s13 = int_to_ptr.vmem [resolvable:$true] %s68_s13 }
  0x11   :  { %v29_v4 = vcombine.high %v25_v2, %v25_v2  ;;  %v34_v5 = vsel %vm33_vm0, %v25_v2, 0.0  ;;  %v30_v6 = vcombine.high %v26_v3, %v26_v3  ;;  %v39_v8 = vsel %vm33_vm0, %v26_v3, 0.0  ;;  %s106_s14 = scalar_lea.vmem %s69_s13, 32  ;;  %p111_p6 = scmp.lt.s32.totalorder %s69_s13, %s69_s13 }
  0x12   :  { %v52_v15 = vsub.s32 %v49_v13, %v51_v14  ;;  %p107_p5 = scmp.ne.s32.totalorder %s69_s13, %s106_s14  ;;  %p112_p7 = scmp.lt.s32.totalorder %s106_s14, %s106_s14 }
  0x13   :  { %v35_v7 = vsel %vm33_vm0, %v29_v4, 0.0  ;;  %v40_v9 = vsel %vm33_vm0, %v30_v6, 0.0 }
  0x14   :  { %v36_v10 = vadd.f32 %v35_v7, %v34_v5  ;;  %v41_v11 = vadd.f32 %v40_v9, %v39_v8  ;;  %p113_p8 = por %p112_p7, %p111_p6 }
  0x16   :  { %37 = vadd.xlane.f32.xlu0 %v36_v10  ;;  %p114_p9 = pnand %p113_p8, %p107_p5 }
  0x1a   :  { %42 = vadd.xlane.f32.xlu0 %v41_v11 }
  0x9f   :  { %v38_v16 = vpop.xlane.xlu0 %37 }
  0xa0   :  { %v44_v17 = vmul.f32 0.00390625, %v38_v16 }
  0xa2   :  { %v53_v18 = vrot.slane %v44_v17, %v52_v15 }
  0xa3   :  { %v43_v19 = vpop.xlane.xlu0 %42 }
  0xa4   :  { %61 = vst.msk [vmem:[#allocation5] sm:$0x1] %vm60_vm1, %v53_v18  ;;  %v45_v20 = vmul.f32 0.00390625, %v43_v19 }
  0xa6   :  { %v57_v21 = vrot.slane %v45_v20, %v52_v15 }
  0xa8   :  { %62 = vst.msk [vmem:[#allocation5 + $0x1] sm:$0x1] %vm60_vm1, %v57_v21 }
  0xa9   :  { %117 = shalt.err (!%p114_p9)
}
  0xaa   :  { %s134_s15 = smov 16   ;;  %s135_s16 = smov 1  }
  0xab   :  { %74 = dma.vmem_to_hbm [thread:$0]  %s69_s13, 32, %s153_s1, [#allocation4], %s134_s15, %s134_s15, %s135_s16  }
  0xac   :  { %128 = dma.done.wait [#allocation4], 32  }
  0xad   :  { %129 = vsyncadd [#allocation4], 4294967264 }
  0xae   :  { %78 = vsyncpa [#allocation3], 1 }
  0xaf   :  { %79 = vsyncpa [#allocation4], 1 }

</bundles_post_ra>
